<compile_context>
chip_gen: v5e
topology: v5e:2x2
jax: 0.10.0
libtpu: 0.0.40
codegen_flags: <defaults>
</compile_context>

<pallas_src>
import jax
import jax.numpy as jnp
from jax.experimental import pallas as pl
from jax.experimental.pallas import tpu as pltpu

LANE = 128


def _round_up(n, m):
    return ((n + m - 1) // m) * m


def mlp_kernel(x_ref, w1_ref, b1_ref, w2_ref, b2_ref, o_ref):
    # f32 -> bf16 cast of the streamed x tile happens in-kernel (VPU, hidden
    # under the DMA of the next tile).
    x = x_ref[...].astype(w1_ref.dtype)
    # fc1 on the MXU with f32 accumulation: (tb, D) @ (D, H)
    h = jnp.dot(x, w1_ref[...], preferred_element_type=jnp.float32)
    # bias + ReLU in f32 on the VPU (safe on v5e, which has no bf16 VALU).
    h = jnp.maximum(h + b1_ref[...], 0.0)
    # fc2 on the MXU: (tb, H) @ (H, C_pad)
    out = jnp.dot(h.astype(w2_ref.dtype), w2_ref[...],
                  preferred_element_type=jnp.float32)
    out = out + b2_ref[...]
    # Rows belonging to the partial tail block hold garbage x data; Pallas
    # masks them on the HBM store.  Safe because there is no cross-row
    # reduction anywhere in this kernel.
    o_ref[...] = out.astype(o_ref.dtype)


def _vmem_bytes(tile, D, H, C_pad, x_isz, out_isz, w_isz):
    x_buf = 2 * tile * D * x_isz             # double-buffered x tiles
    o_buf = 2 * tile * C_pad * out_isz       # double-buffered out tiles
    w_buf = 2 * (D * H + H * C_pad) * w_isz  # weights (grid-invariant, resident)
    b_buf = 2 * (H + C_pad) * 4              # biases (f32)
    return x_buf + o_buf + w_buf + b_buf


def _choose_batch_tile(B, requested, D, H, C_pad, x_isz, out_isz, w_isz,
                       vmem_budget):
    # Never exceed the (8-aligned) batch.
    tile = min(requested, _round_up(B, 8))
    # v7x megacore: keep at least 2 grid steps on non-tiny batches so the
    # "parallel" batch axis actually shards across both TensorCores.
    if B > 256:
        tile = min(tile, max(256, _round_up(-(-B // 2), 256)))
    tile = max(_round_up(tile, 8), 8)
    # Shrink until the double-buffered footprint fits the VMEM budget
    # (v7x: 64 MiB physical; v5e: 16 MiB default scoped limit).
    while (tile > 8 and
           _vmem_bytes(tile, D, H, C_pad, x_isz, out_isz, w_isz) > vmem_budget):
        tile = max(8, _round_up(tile // 2, 8))
    return tile


def mlp_classifier_forward(x, w1, b1, w2, b2, *, batch_tile=1024,
                           compute_dtype=jnp.bfloat16,
                           out_dtype=jnp.float32,
                           unpad_output=True):
    """x: (B, input_dim) (any float dtype; cast to bf16 in-kernel for the MXU).
    w1: (input_dim, 128), b1: (128,), w2: (128, num_classes), b2: (num_classes,).
    Weights stored pre-transposed as (in, out).  Returns (B, num_classes)
    logits in `out_dtype` (or the padded (B, 128) logits if unpad_output=False)."""
    B, D = x.shape
    H = w1.shape[1]
    C = w2.shape[1]
    assert w1.shape == (D, H) and b1.shape == (H,)
    assert w2.shape == (H, C) and b2.shape == (C,)

    C_pad = _round_up(max(C, LANE), LANE)          # lane-dense output store
    x_isz = jnp.dtype(x.dtype).itemsize
    out_isz = jnp.dtype(out_dtype).itemsize
    w_isz = jnp.dtype(compute_dtype).itemsize

    vmem_budget = 36 << 20                         # conservative across v5e/v6e/v7x
    tile = _choose_batch_tile(B, batch_tile, D, H, C_pad, x_isz, out_isz,
                              w_isz, vmem_budget)
    grid = (pl.cdiv(B, tile),)                     # tail block masked by Pallas

    # Parameter prep only (tiny vs. the x / logits streams).
    w1_c = w1.astype(compute_dtype)
    w2_c = jnp.pad(w2, ((0, 0), (0, C_pad - C))).astype(compute_dtype)
    b1_2d = b1.astype(jnp.float32).reshape(1, H)
    b2_2d = jnp.pad(b2.astype(jnp.float32), (0, C_pad - C)).reshape(1, C_pad)

    flops = 2 * B * D * H + 2 * B * H * C_pad
    bytes_accessed = (B * D * x_isz + B * C_pad * out_isz
                      + (D * H + H * C_pad) * w_isz + (H + C_pad) * 4)
    vmem_est = _vmem_bytes(tile, D, H, C_pad, x_isz, out_isz, w_isz)
    vmem_limit = int(min(max(int(vmem_est * 1.3) + (2 << 20), 16 << 20), 56 << 20))

    out = pl.pallas_call(
        mlp_kernel,
        out_shape=jax.ShapeDtypeStruct((B, C_pad), out_dtype),
        grid_spec=pl.GridSpec(
            grid=grid,
            in_specs=[
                pl.BlockSpec((tile, D), lambda i: (i, 0)),    # x tile (streamed)
                pl.BlockSpec((D, H), lambda i: (0, 0)),       # W1 (grid-invariant)
                pl.BlockSpec((1, H), lambda i: (0, 0)),       # b1
                pl.BlockSpec((H, C_pad), lambda i: (0, 0)),   # W2 (padded)
                pl.BlockSpec((1, C_pad), lambda i: (0, 0)),   # b2 (padded)
            ],
            out_specs=pl.BlockSpec((tile, C_pad), lambda i: (i, 0)),
        ),
        compiler_params=pltpu.CompilerParams(
            # batch axis is data-parallel -> sharded across v7x's 2 TensorCores.
            dimension_semantics=("parallel",),
            vmem_limit_bytes=vmem_limit),
        cost_estimate=pl.CostEstimate(flops=flops, transcendentals=0,
                                      bytes_accessed=bytes_accessed),
    )(x, w1_c, b1_2d, w2_c, b2_2d)

    if unpad_output:
        # NOTE: extra HBM pass over the logits; bandwidth-sensitive callers
        # should pass unpad_output=False and ignore columns >= num_classes.
        return out[:, :C]
    return out


def init_params(key, input_dim, num_classes, hidden=128, dtype=jnp.float32):
    """Deterministic init mimicking torch.nn.Linear default (uniform +-1/sqrt(fan_in)).
    Weights are returned pre-transposed to (in, out)."""
    k1, k2, k3, k4 = jax.random.split(key, 4)
    bound1 = 1.0 / jnp.sqrt(input_dim)
    w1 = jax.random.uniform(k1, (input_dim, hidden), dtype, -bound1, bound1)
    b1 = jax.random.uniform(k2, (hidden,), dtype, -bound1, bound1)
    bound2 = 1.0 / jnp.sqrt(hidden)
    w2 = jax.random.uniform(k3, (hidden, num_classes), dtype, -bound2, bound2)
    b2 = jax.random.uniform(k4, (num_classes,), dtype, -bound2, bound2)
    return w1, b1, w2, b2


if __name__ == "__main__":
    # Small shapes consistent with the module: flattened features -> 128 -> classes.
    batch = 8
    input_dim = 256
    num_classes = 10

    key = jax.random.PRNGKey(0)
    kx, kp = jax.random.split(key)
    x = jax.random.normal(kx, (batch, input_dim), jnp.float32)
    w1, b1, w2, b2 = init_params(kp, input_dim, num_classes)

    out = mlp_classifier_forward(x, w1, b1, w2, b2)
    out = jax.block_until_ready(out)

    # Pure-JAX f32 reference of the forward semantics. Tolerance loosened because
    # the kernel computes the matmuls with bf16 operands (f32 accumulation).
    ref = jnp.maximum(x @ w1 + b1, 0.0) @ w2 + b2
    assert out.shape == (batch, num_classes)
    assert jnp.allclose(out, ref, atol=3e-2, rtol=3e-2), "mismatch vs reference"

    print("KERNEL_OK")
</pallas_src>

<mosaic_0001>
module attributes {stable_mosaic.version = 11 : i64} {
  func.func @mlp_kernel(%arg0: i32, %arg1: memref<8x256xf32, #tpu.memory_space<vmem>>, %arg2: memref<256x128xbf16, #tpu.memory_space<vmem>>, %arg3: memref<1x128xf32, #tpu.memory_space<vmem>>, %arg4: memref<128x128xbf16, #tpu.memory_space<vmem>>, %arg5: memref<1x128xf32, #tpu.memory_space<vmem>>, %arg6: memref<8x128xf32, #tpu.memory_space<vmem>>) attributes {dimension_semantics = [#tpu.dimension_semantics<parallel>], iteration_bounds = array<i64: 1>, scalar_prefetch = 0 : i64, scratch_operands = 0 : i64, tpu.core_type = #tpu.core_type<tc>, window_params = [{transform_indices = @transform_0, window_bounds = array<i64: 8, 256>}, {pipeline_mode = #tpu.pipeline_mode<synchronous>, transform_indices = @transform_1, window_bounds = array<i64: 256, 128>}, {pipeline_mode = #tpu.pipeline_mode<synchronous>, transform_indices = @transform_2, window_bounds = array<i64: 1, 128>}, {pipeline_mode = #tpu.pipeline_mode<synchronous>, transform_indices = @transform_3, window_bounds = array<i64: 128, 128>}, {pipeline_mode = #tpu.pipeline_mode<synchronous>, transform_indices = @transform_4, window_bounds = array<i64: 1, 128>}, {transform_indices = @transform_5, window_bounds = array<i64: 8, 128>}]} {
    %c0 = arith.constant 0 : index
    %c0_0 = arith.constant 0 : index
    %0 = vector.load %arg1[%c0, %c0_0] : memref<8x256xf32, #tpu.memory_space<vmem>>, vector<8x256xf32>
    %1 = arith.truncf %0 : vector<8x256xf32> to vector<8x256xbf16>
    %c0_1 = arith.constant 0 : index
    %c0_2 = arith.constant 0 : index
    %2 = vector.load %arg2[%c0_1, %c0_2] : memref<256x128xbf16, #tpu.memory_space<vmem>>, vector<256x128xbf16>
    %cst = arith.constant dense<0.000000e+00> : vector<8x128xf32>
    %3 = tpu.matmul %1, %2, %cst {dimension_numbers = #tpu.dot_dimension_numbers<[1], [0], [0], [1], [0, 0, 1, 1], [], []>} : vector<8x256xbf16>, vector<256x128xbf16>, vector<8x128xf32> -> vector<8x128xf32>
    %c0_3 = arith.constant 0 : index
    %c0_4 = arith.constant 0 : index
    %4 = vector.load %arg3[%c0_3, %c0_4] : memref<1x128xf32, #tpu.memory_space<vmem>>, vector<1x128xf32>
    %5 = vector.broadcast %4 : vector<1x128xf32> to vector<8x128xf32>
    %6 = arith.addf %3, %5 : vector<8x128xf32>
    %cst_5 = arith.constant 0.000000e+00 : f32
    %7 = vector.broadcast %cst_5 : f32 to vector<8x128xf32>
    %8 = arith.maximumf %6, %7 : vector<8x128xf32>
    %9 = arith.truncf %8 : vector<8x128xf32> to vector<8x128xbf16>
    %c0_6 = arith.constant 0 : index
    %c0_7 = arith.constant 0 : index
    %10 = vector.load %arg4[%c0_6, %c0_7] : memref<128x128xbf16, #tpu.memory_space<vmem>>, vector<128x128xbf16>
    %cst_8 = arith.constant dense<0.000000e+00> : vector<8x128xf32>
    %11 = tpu.matmul %9, %10, %cst_8 {dimension_numbers = #tpu.dot_dimension_numbers<[1], [0], [0], [1], [0, 0, 1, 1], [], []>} : vector<8x128xbf16>, vector<128x128xbf16>, vector<8x128xf32> -> vector<8x128xf32>
    %c0_9 = arith.constant 0 : index
    %c0_10 = arith.constant 0 : index
    %12 = vector.load %arg5[%c0_9, %c0_10] : memref<1x128xf32, #tpu.memory_space<vmem>>, vector<1x128xf32>
    %13 = vector.broadcast %12 : vector<1x128xf32> to vector<8x128xf32>
    %14 = arith.addf %11, %13 : vector<8x128xf32>
    %c0_11 = arith.constant 0 : index
    %c0_12 = arith.constant 0 : index
    %15 = vector.load %arg6[%c0_11, %c0_12] : memref<8x128xf32, #tpu.memory_space<vmem>>, vector<8x128xf32>
    tpu.vector_store %arg6[%c0_11, %c0_12], %14 {strides = array<i32>} : memref<8x128xf32, #tpu.memory_space<vmem>>, vector<8x128xf32>,
    return
  }
  func.func @transform_0(%arg0: i32) -> (i32, i32) {
    %c0_i32 = arith.constant 0 : i32
    %c0_i32_0 = arith.constant 0 : i32
    return %arg0, %c0_i32 : i32, i32
  }
  func.func @transform_1(%arg0: i32) -> (i32, i32) {
    %c0_i32 = arith.constant 0 : i32
    %c0_i32_0 = arith.constant 0 : i32
    %c0_i32_1 = arith.constant 0 : i32
    return %c0_i32, %c0_i32_0 : i32, i32
  }
  func.func @transform_2(%arg0: i32) -> (i32, i32) {
    %c0_i32 = arith.constant 0 : i32
    %c0_i32_0 = arith.constant 0 : i32
    %c0_i32_1 = arith.constant 0 : i32
    return %c0_i32, %c0_i32_0 : i32, i32
  }
  func.func @transform_3(%arg0: i32) -> (i32, i32) {
    %c0_i32 = arith.constant 0 : i32
    %c0_i32_0 = arith.constant 0 : i32
    %c0_i32_1 = arith.constant 0 : i32
    return %c0_i32, %c0_i32_0 : i32, i32
  }
  func.func @transform_4(%arg0: i32) -> (i32, i32) {
    %c0_i32 = arith.constant 0 : i32
    %c0_i32_0 = arith.constant 0 : i32
    %c0_i32_1 = arith.constant 0 : i32
    return %c0_i32, %c0_i32_0 : i32, i32
  }
  func.func @transform_5(%arg0: i32) -> (i32, i32) {
    %c0_i32 = arith.constant 0 : i32
    %c0_i32_0 = arith.constant 0 : i32
    return %arg0, %c0_i32 : i32, i32
  }
}

</mosaic_0001>

<bundles_post_ra>
// kernel: tpu_custom_call.1
= control target key start
LH: loop header
LB: loop body
LE: loop exit
PB: predicated region body
PF: predicated region fallthrough
CT: control target
= control target key end

     0   :  { %10 = vsyncpa [#allocation3], 0  ;;  %s614_s0 = inlined_call_operand.hbm [shape: f32[8,256], index: 0, kind: input, shape index: {}]   ;;  %s615_s1 = inlined_call_operand.hbm [shape: bf16[256,128], index: 1, kind: input, shape index: {}]   ;;  %s616_s2 = inlined_call_operand.vmem [shape: f32[1,128], index: 2, kind: input, shape index: {}]   ;;  %s617_s3 = inlined_call_operand.hbm [shape: bf16[128,128], index: 3, kind: input, shape index: {}]   ;;  %s618_s4 = inlined_call_operand.vmem [shape: f32[1,128], index: 4, kind: input, shape index: {}]   ;;  %s619_s5 = inlined_call_operand.hbm [shape: f32[8,128], index: 5, kind: output, shape index: {}]  }
   0x1   :  { %11 = vsyncpa [#allocation6], 0  ;;  %s28_s20 = sshll.u32 %s615_s1, 4  ;;  %s29_s20 = int_to_ptr.hbm [resolvable:$true] %s28_s20 }
   0x2   :  { %12 = vsyncpa [#allocation4], 0  ;;  %s560_s21 = smov [#allocation5]   ;;  %s18_s25 = sshll.u32 %s614_s0, 4  ;;  %s19_s25 = int_to_ptr.hbm [resolvable:$true] %s18_s25 }
   0x3   :  { %s30_s22 = sshll.u32 %s560_s21, 4  ;;  %s561_s26 = smov 64   ;;  %s31_s22 = int_to_ptr.vmem [resolvable:$true] %s30_s22 }
   0x4   :  { %s562_s27 = smov 4   ;;  %s563_s28 = smov [#allocation2]  }
   0x5   :  { %36 = dma.hbm_to_vmem [thread:$0]  %s29_s20, 2048, %s31_s22, [#allocation6], %s561_s26, %s561_s26, %s562_s27  }
   0x6   :  { %s20_s29 = sshll.u32 %s563_s28, 4  ;;  %s43_s7 = sshll.u32 %s617_s3, 4  ;;  %s21_s29 = int_to_ptr.vmem [resolvable:$true] %s20_s29  ;;  %s44_s7 = int_to_ptr.hbm [resolvable:$true] %s43_s7 }
   0x7   :  { %23 = dma.hbm_to_vmem [thread:$0]  %s19_s25, 256, %s21_s29, [#allocation3]  }
   0x8   :  { %s564_s1 = smov [#allocation7]  }
   0x9   :  { %s45_s8 = sshll.u32 %s564_s1, 4  ;;  %s46_s8 = int_to_ptr.vmem [resolvable:$true] %s45_s8 }
   0xa   :  { %51 = dma.hbm_to_vmem [thread:$0]  %s44_s7, 1024, %s46_s8, [#allocation6], %s561_s26, %s561_s26, %s562_s27  }
   0xb   :  { %554 = dma.done.wait [#allocation3], 256  }
   0xc   :  { %555 = vsyncadd [#allocation3], 4294967040 }
   0xd   :  { %556 = dma.done.wait [#allocation6], 3072  }
   0xe   :  { %557 = vsyncadd [#allocation6], 4294964224  ;;  %v433_v0 = vld [vmem:[#allocation5 + $0x38] sm:$0xff]  ;;  %v432_v2 = vld [vmem:[#allocation5 + $0x30] sm:$0xff]  ;;  %s565_s11 = smov [#allocation8]   ;;  %s319_s15 = sshll.u32 %s619_s5, 4  ;;  %s320_s15 = int_to_ptr.hbm [resolvable:$true] %s319_s15 }
   0xf   :  { %v441_v1 = vld [vmem:[#allocation5 + $0x78] sm:$0xff]  ;;  %202 = vmatpush.bf16.msra.mxu0 %v433_v0  ;;  %v440_v3 = vld [vmem:[#allocation5 + $0x70] sm:$0xff]  ;;  %v431_v4 = vld [vmem:[#allocation5 + $0x28] sm:$0xff]  ;;  %s317_s12 = sshll.u32 %s565_s11, 4  ;;  %s318_s12 = int_to_ptr.vmem [resolvable:$true] %s317_s12 }
  0x10   :  { %215 = vmatpush.bf16.msra.mxu1 %v441_v1  ;;  %v439_v5 = vld [vmem:[#allocation5 + $0x68] sm:$0xff]  ;;  %v449_v6 = vld [vmem:[#allocation7 + $0x38] sm:$0xff]  ;;  %v448_v7 = vld [vmem:[#allocation7 + $0x30] sm:$0xff] }
  0x11   :  { %298 = vmatpush.bf16.msra.mxu2 %v449_v6  ;;  %v430_v8 = vld [vmem:[#allocation5 + $0x20] sm:$0xff]  ;;  %v447_v10 = vld [vmem:[#allocation7 + $0x28] sm:$0xff]  ;;  %v429_v11 = vld [vmem:[#allocation5 + $0x18] sm:$0xff] }
  0x12   :  { %v438_v9 = vld [vmem:[#allocation5 + $0x60] sm:$0xff]  ;;  %v437_v12 = vld [vmem:[#allocation5 + $0x58] sm:$0xff]  ;;  %v428_v14 = vld [vmem:[#allocation5 + $0x10] sm:$0xff] }
  0x13   :  { %203 = vmatpush.bf16.msra.mxu0 %v432_v2  ;;  %v446_v13 = vld [vmem:[#allocation7 + $0x20] sm:$0xff]  ;;  %v436_v15 = vld [vmem:[#allocation5 + $0x50] sm:$0xff]  ;;  %v445_v16 = vld [vmem:[#allocation7 + $0x18] sm:$0xff] }
  0x14   :  { %216 = vmatpush.bf16.msra.mxu1 %v440_v3  ;;  %v427_v17 = vld [vmem:[#allocation5 + $0x8] sm:$0xff]  ;;  %v444_v19 = vld [vmem:[#allocation7 + $0x10] sm:$0xff]  ;;  %v426_v20 = vld [vmem:[#allocation5] sm:$0xff] }
  0x15   :  { %299 = vmatpush.bf16.msra.mxu2 %v448_v7  ;;  %v435_v18 = vld [vmem:[#allocation5 + $0x48] sm:$0xff]  ;;  %v434_v21 = vld [vmem:[#allocation5 + $0x40] sm:$0xff]  ;;  %v66_v22 = vld [vmem:[#allocation2] sm:$0xff] }
  0x16   :  { %v67_v23 = vld [vmem:[#allocation2 + $0x8] sm:$0xff]  ;;  %v68_v24 = vpack.c.bf16 %v66_v22, %v66_v22  ;;  %v443_v26 = vld [vmem:[#allocation7 + $0x8] sm:$0xff]  ;;  %v442_v27 = vld [vmem:[#allocation7] sm:$0xff] }
  0x17   :  { %204 = vmatpush.bf16.msra.mxu0 %v431_v4  ;;  %v69_v25 = vpack.c.bf16 %v67_v23, %v67_v23  ;;  %v456_v28 = vld [vmem:[%s616_s2] ss:$0 sm:$0xff] }
  0x18   :  { %217 = vmatpush.bf16.msra.mxu1 %v439_v5  ;;  %v457_v37 = vld [vmem:[%s618_s4] ss:$0 sm:$0xff] }
  0x19   :  { %300 = vmatpush.bf16.msra.mxu2 %v447_v10 }
  0x1b   :  { %205 = vmatpush.bf16.msra.mxu0 %v430_v8 }
  0x1c   :  { %218 = vmatpush.bf16.msra.mxu1 %v438_v9 }
  0x1d   :  { %301 = vmatpush.bf16.msra.mxu2 %v446_v13 }
  0x1f   :  { %206 = vmatpush.bf16.msra.mxu0 %v429_v11 }
  0x20   :  { %219 = vmatpush.bf16.msra.mxu1 %v437_v12 }
  0x21   :  { %302 = vmatpush.bf16.msra.mxu2 %v445_v16 }
  0x23   :  { %207 = vmatpush.bf16.msra.mxu0 %v428_v14 }
  0x24   :  { %220 = vmatpush.bf16.msra.mxu1 %v436_v15 }
  0x25   :  { %303 = vmatpush.bf16.msra.mxu2 %v444_v19 }
  0x27   :  { %208 = vmatpush.bf16.msra.mxu0 %v427_v17 }
  0x28   :  { %221 = vmatpush.bf16.msra.mxu1 %v435_v18 }
  0x29   :  { %304 = vmatpush.bf16.msra.mxu2 %v443_v26 }
  0x2b   :  { %209 = vmatpush.bf16.msra.mxu0 %v426_v20 }
  0x2c   :  { %222 = vmatpush.bf16.msra.mxu1 %v434_v21 }
  0x2d   :  { %305 = vmatpush.bf16.msra.mxu2 %v442_v27 }
  0x2e   :  { %210 = vmatmul.bf16.vlgmr.msra.gmra.mxu0 %v68_v24 }
  0x2f   :  { %223 = vmatmul.bf16.vlgmr.msra.gmra.mxu1 %v69_v25 }
  0xab   :  { %v211_v29 = vpop.f32.mrf.mxu0 }
  0xac   :  { %v224_v30 = vpop.f32.mrf.mxu1  ;;  %v212_v31 = vadd.f32 %v456_v28, %v211_v29 }
  0xae   :  { %v225_v32 = vadd.f32 %v224_v30, %v212_v31 }
  0xb0   :  { %v228_v33 = vmax.f32 %v225_v32, 0.0 }
  0xb2   :  { %v229_v34 = vpack.c.bf16 %v228_v33, %v228_v33 }
  0xb3   :  { %v213_v35 = vpop.f32.mrf.mxu0 }
  0xb4   :  { %v226_v36 = vpop.f32.mrf.mxu1  ;;  %306 = vmatmul.bf16.vlgmr.msra.gmra.mxu2 %v229_v34 }
 0x137   :  { %v307_v38 = vpop.f32.mrf.mxu2 }
 0x138   :  { %v308_v39 = vadd.f32 %v457_v37, %v307_v38 }
 0x13a   :  { %311 = vst [vmem:[#allocation8] sm:$0xff] %v308_v39 }
 0x13b   :  { %322 = dma.vmem_to_hbm [thread:$0]  %s318_s12, 128, %s320_s15, [#allocation4]  }
 0x13f   :  { %v309_v40 = vpop.f32.mrf.mxu2 }
 0x140   :  { %558 = dma.done.wait [#allocation4], 128  }
 0x141   :  { %559 = vsyncadd [#allocation4], 4294967168 }
 0x142   :  { %327 = vsyncpa [#allocation3], 1 }
 0x143   :  { %328 = vsyncpa [#allocation6], 1 }
 0x144   :  { %329 = vsyncpa [#allocation4], 1 }

</bundles_post_ra>
